<compile_context>
chip_gen: v7x
topology: tpu7x:2x2x1
jax: 0.10.0
libtpu: 0.0.40
codegen_flags: <defaults>
</compile_context>

<pallas_src>
import jax
import jax.numpy as jnp
from jax import lax
from jax.experimental import pallas as pl
from jax.experimental.pallas import tpu as pltpu


def _round_up(x, m):
    return (x + m - 1) // m * m


def _tn_cap():
    """N-tile cap: 1024 on 128 MiB-VMEM parts (v5e/v6e), 512 on v7x (64 MiB)."""
    try:
        vmem = int(pltpu.get_tpu_info().vmem_capacity_bytes)
    except Exception:
        vmem = 64 << 20  # conservative (v7x)
    return 1024 if vmem >= (100 << 20) else 512


def _pick_n_tile(n_pad, cap):
    """Largest lane-dense (multiple-of-128) tile dividing n_pad, capped."""
    t = min(n_pad, cap)
    while n_pad % t:
        t -= 128
    return t


def _pick_m_tile(m_pad, cap=256):
    """Largest multiple-of-8 tile <= cap dividing m_pad.

    Bigger TM amortizes the per-M-tile re-stream of w2 from HBM.  grid[0] == 1
    only happens for small batches (m_pad <= cap), where splitting would just
    double w2 traffic on single-TC chips.
    """
    tm = max(8, min(m_pad, cap) - (min(m_pad, cap) % 8))
    while m_pad % tm:
        tm -= 8
    return tm


def mlp_kernel(ids_ref, weff_ref, b1_ref, w2_ref, b2_ref, o_ref, h_ref):
    """One (m, n) program of the fused MLP forward.

    ids_ref:  [TM, S]    int32 shifted token ids (id + s*V); padded rows -> 0
    weff_ref: [SVp, H]   bf16 folded (embed @ w1), zero-padded rows past S*V
    b1_ref:   [1, H]     f32
    w2_ref:   [H, TN]    bf16 N-tile of linear2 weight (zero-padded cols)
    b2_ref:   [1, TN]    f32
    o_ref:    [TM, TN]   output tile
    h_ref:    [TM, H]    f32 VMEM scratch; persists across the (sequential) n axis
    """
    # Stage 1 (embedding gather + linear1 + ReLU): computed only at the first
    # N block of each M tile, cached in VMEM scratch for the remaining N blocks.
    @pl.when(pl.program_id(1) == 0)
    def _():
        tm, s_len = ids_ref.shape
        sv_pad = weff_ref.shape[0]
        ids = ids_ref[...]                                          # [TM, S]
        col = lax.broadcasted_iota(jnp.int32, (tm, sv_pad), 1)      # [TM, SVp]
        # Stacked one-hot over the folded K dim.  S is small and the loop only
        # carries a boolean reduction, so vreg pressure stays bounded even with
        # static unroll (no per-position matmul intermediates anymore).
        hit = jnp.zeros((tm, sv_pad), jnp.bool_)
        for s in range(s_len):
            hit = hit | (ids[:, s:s + 1] == col)
        onehot = jnp.where(hit, 1.0, 0.0).astype(jnp.bfloat16)      # exact 0/1
        # One full-depth MXU matmul: [TM, SVp] @ [SVp, H], f32 accumulation.
        h = jnp.dot(onehot, weff_ref[...], preferred_element_type=jnp.float32)
        h_ref[...] = jnp.maximum(h + b1_ref[...], 0.0)              # f32 VPU epilogue

    # Stage 2 (linear2 N-tile) reads the cached h.
    out = jnp.dot(h_ref[...].astype(jnp.bfloat16), w2_ref[...],
                  preferred_element_type=jnp.float32)               # [TM, TN]
    o_ref[...] = (out + b2_ref[...]).astype(o_ref.dtype)


def mlp_pallas(ids, w_eff, b1, w2, b2, *, out_dtype=jnp.float32):
    m_pad, s_len = ids.shape
    sv_pad, h_dim = w_eff.shape
    n_pad = w2.shape[1]

    tm = _pick_m_tile(m_pad)
    tn = _pick_n_tile(n_pad, _tn_cap())
    grid = (m_pad // tm, n_pad // tn)
    out_isz = jnp.dtype(out_dtype).itemsize

    # Explicit VMEM budget from the actual tiles (+ headroom): double-buffered
    # varying blocks, single-buffered grid-invariant blocks, h scratch.
    est_vmem = (2 * tm * s_len * 4          # ids
                + sv_pad * h_dim * 2        # W_eff (grid-invariant)
                + h_dim * 4                 # b1
                + 2 * h_dim * tn * 2        # w2 N-tile
                + 2 * tn * 4                # b2 N-tile
                + 2 * tm * tn * out_isz     # out tile
                + tm * h_dim * 4)           # h scratch
    vmem_limit = int(min(100 << 20, max(2 * est_vmem, 32 << 20)))

    # Advisory cost (stage-1 flops count the one-hot matmul the kernel executes).
    flops = 2 * m_pad * sv_pad * h_dim + 2 * m_pad * h_dim * n_pad
    bytes_accessed = int(m_pad * s_len * 4 + sv_pad * h_dim * 2 + h_dim * 4
                         + grid[0] * (h_dim * n_pad * 2 + n_pad * 4)
                         + m_pad * n_pad * out_isz)

    def build(single_buffer_invariants):
        inv = ({"pipeline_mode": pl.Buffered(buffer_count=1)}
               if single_buffer_invariants else {})
        return pl.pallas_call(
            mlp_kernel,
            out_shape=jax.ShapeDtypeStruct((m_pad, n_pad), out_dtype),
            grid=grid,
            in_specs=[
                pl.BlockSpec((tm, s_len), lambda m, n: (m, 0)),          # ids
                pl.BlockSpec((sv_pad, h_dim), lambda m, n: (0, 0), **inv),  # W_eff
                pl.BlockSpec((1, h_dim), lambda m, n: (0, 0), **inv),    # b1
                pl.BlockSpec((h_dim, tn), lambda m, n: (0, n)),          # w2 tile
                pl.BlockSpec((1, tn), lambda m, n: (0, n)),              # b2 tile
            ],
            out_specs=pl.BlockSpec((tm, tn), lambda m, n: (m, n)),
            scratch_shapes=[pltpu.VMEM((tm, h_dim), jnp.float32)],       # cached h
            compiler_params=pltpu.CompilerParams(
                # n must stay sequential per M-tile so the h cache is valid;
                # m is the parallel axis for v7x megacore sharding.
                dimension_semantics=("parallel", "arbitrary"),
                vmem_limit_bytes=vmem_limit),
            cost_estimate=pl.CostEstimate(
                flops=flops, transcendentals=0, bytes_accessed=bytes_accessed),
        )

    try:
        return build(True)(ids, w_eff, b1, w2, b2)
    except Exception:
        # This JAX build rejects single-buffering of grid-invariant operands;
        # fall back to the default double-buffered pipeline (correctness first).
        return build(False)(ids, w_eff, b1, w2, b2)


class MLPPallas:
    def __init__(self, seq_len, embed_dim, vocab_size, hidden_dim, key,
                 out_dtype=jnp.float32):
        self.seq_len = int(seq_len)
        self.embed_dim = int(embed_dim)
        self.vocab_size = int(vocab_size)
        self.hidden_dim = int(hidden_dim)
        self.out_dtype = out_dtype  # f32 = PyTorch semantics; bf16 halves writeback

        k_emb, k_w1, k_b1, k_w2, k_b2 = jax.random.split(key, 5)

        # nn.Embedding(vocab_size, embed_dim, padding_idx=0): N(0,1), row 0 zero.
        emb = jax.random.normal(k_emb, (self.vocab_size, self.embed_dim),
                                dtype=jnp.float32)
        self.embed = emb.at[0].set(0.0)

        in1 = self.seq_len * self.embed_dim
        self.out_dim = self.seq_len * self.vocab_size

        # nn.Linear init: U(-1/sqrt(fan_in), 1/sqrt(fan_in)); weights stored
        # transposed [in, out] as f32 master copies.
        lim1 = 1.0 / float(in1) ** 0.5
        self.w1 = jax.random.uniform(k_w1, (in1, self.hidden_dim),
                                     minval=-lim1, maxval=lim1, dtype=jnp.float32)
        self.b1 = jax.random.uniform(k_b1, (1, self.hidden_dim),
                                     minval=-lim1, maxval=lim1, dtype=jnp.float32)

        lim2 = 1.0 / float(self.hidden_dim) ** 0.5
        self.w2 = jax.random.uniform(k_w2, (self.hidden_dim, self.out_dim),
                                     minval=-lim2, maxval=lim2, dtype=jnp.float32)
        self.b2 = jax.random.uniform(k_b2, (1, self.out_dim),
                                     minval=-lim2, maxval=lim2, dtype=jnp.float32)

        # Fold embedding into linear1 (f32 fold, bf16 MXU copy):
        #   W_eff[s*V + v, :] = embed[v, :] @ w1[s*E:(s+1)*E, :]
        w1_3d = self.w1.reshape(self.seq_len, self.embed_dim, self.hidden_dim)
        w_eff = jnp.einsum("ve,seh->svh", self.embed, w1_3d).reshape(
            self.out_dim, self.hidden_dim)

        # Lane-dense padding (multiples of 128) of the folded K dim and out_dim;
        # padded rows/cols are zero and never selected / sliced off outside.
        self.sv_pad = _round_up(self.out_dim, 128)
        self.n_pad = _round_up(self.out_dim, 128)
        self.w_eff_bf16 = (jnp.zeros((self.sv_pad, self.hidden_dim), jnp.float32)
                           .at[:self.out_dim].set(w_eff)).astype(jnp.bfloat16)
        self.w2_pad_bf16 = (jnp.zeros((self.hidden_dim, self.n_pad), jnp.float32)
                            .at[:, :self.out_dim].set(self.w2)).astype(jnp.bfloat16)
        self.b2_pad = (jnp.zeros((1, self.n_pad), jnp.float32)
                       .at[:, :self.out_dim].set(self.b2))

    def __call__(self, x):
        # x: [bs, seq_len] int token ids
        bs, seq_len = x.shape
        assert seq_len == self.seq_len
        # Pad batch to a multiple of 8 sublanes; padded rows hold shifted-id 0,
        # which selects the zero row of W_eff (padding_idx=0) and is sliced off.
        m_pad = _round_up(max(bs, 8), 8)
        offsets = (jnp.arange(self.seq_len, dtype=jnp.int32)
                   * self.vocab_size)[None, :]
        ids = jnp.zeros((m_pad, self.seq_len), jnp.int32)
        ids = ids.at[:bs].set(x.astype(jnp.int32) + offsets)

        out = mlp_pallas(ids, self.w_eff_bf16, self.b1, self.w2_pad_bf16,
                         self.b2_pad, out_dtype=self.out_dtype)
        out = out[:bs, :self.out_dim]
        return out.reshape(bs, self.seq_len, self.vocab_size)


def _reference_f32(model: MLPPallas, x):
    """Pure-JAX f32 reference of the PyTorch forward (master params)."""
    emb = jnp.take(model.embed, x, axis=0)
    h = emb.reshape(x.shape[0], -1) @ model.w1 + model.b1[0]
    h = jnp.maximum(h, 0.0)
    o = h @ model.w2 + model.b2[0]
    return o.reshape(x.shape[0], model.seq_len, model.vocab_size)


def _reference_bf16(model: MLPPallas, x):
    """Pure-JAX reference matching the kernel's folded bf16 / f32-accum math."""
    bs = x.shape[0]
    shifted = (x.astype(jnp.int32)
               + (jnp.arange(model.seq_len, dtype=jnp.int32)
                  * model.vocab_size)[None, :])
    onehot = jax.nn.one_hot(shifted, model.sv_pad, dtype=jnp.float32).sum(axis=1)
    h = jnp.dot(onehot.astype(jnp.bfloat16), model.w_eff_bf16,
                preferred_element_type=jnp.float32) + model.b1[0]
    h = jnp.maximum(h, 0.0)
    o = jnp.dot(h.astype(jnp.bfloat16), model.w2_pad_bf16,
                preferred_element_type=jnp.float32) + model.b2_pad[0]
    o = o[:, :model.out_dim]
    return o.reshape(bs, model.seq_len, model.vocab_size)


if __name__ == "__main__":
    key = jax.random.PRNGKey(0)
    k_params, k_x = jax.random.split(key)

    bs, seq_len, embed_dim, vocab_size, hidden_dim = 2, 8, 16, 32, 64
    model = MLPPallas(seq_len, embed_dim, vocab_size, hidden_dim, k_params)

    x = jax.random.randint(k_x, (bs, seq_len), 0, vocab_size, dtype=jnp.int32)

    out = jax.block_until_ready(model(x))
    assert out.shape == (bs, seq_len, vocab_size)

    # Tight check against a reference using the same folded bf16 operands.
    ref_bf16 = _reference_bf16(model, x)
    assert jnp.allclose(out, ref_bf16, atol=2e-4, rtol=2e-4), \
        float(jnp.max(jnp.abs(out - ref_bf16)))

    # Looser check against the exact f32 PyTorch-equivalent forward
    # (bf16 MXU operands are an intentional precision choice).
    ref_f32 = _reference_f32(model, x)
    assert jnp.allclose(out, ref_f32, atol=5e-2, rtol=5e-2), \
        float(jnp.max(jnp.abs(out - ref_f32)))

    print("KERNEL_OK")
</pallas_src>

<mosaic_0001>
module attributes {stable_mosaic.version = 11 : i64} {
  func.func @mlp_kernel(%arg0: i32, %arg1: i32, %arg2: memref<8x8xi32, #tpu.memory_space<vmem>>, %arg3: memref<256x64xbf16, #tpu.memory_space<vmem>>, %arg4: memref<1x64xf32, #tpu.memory_space<vmem>>, %arg5: memref<64x256xbf16, #tpu.memory_space<vmem>>, %arg6: memref<1x256xf32, #tpu.memory_space<vmem>>, %arg7: memref<8x256xf32, #tpu.memory_space<vmem>>, %arg8: memref<8x64xf32, #tpu.memory_space<vmem>>) attributes {dimension_semantics = [#tpu.dimension_semantics<parallel>, #tpu.dimension_semantics<arbitrary>], iteration_bounds = array<i64: 1, 1>, scalar_prefetch = 0 : i64, scratch_operands = 1 : i64, tpu.core_type = #tpu.core_type<tc>, window_params = [{transform_indices = @transform_0, window_bounds = array<i64: 8, 8>}, {pipeline_mode = #tpu.pipeline_mode<synchronous>, transform_indices = @transform_1, window_bounds = array<i64: 256, 64>}, {pipeline_mode = #tpu.pipeline_mode<synchronous>, transform_indices = @transform_2, window_bounds = array<i64: 1, 64>}, {transform_indices = @transform_3, window_bounds = array<i64: 64, 256>}, {transform_indices = @transform_4, window_bounds = array<i64: 1, 256>}, {transform_indices = @transform_5, window_bounds = array<i64: 8, 256>}]} {
    %c0_i32 = arith.constant 0 : i32
    %0 = arith.cmpi eq, %arg1, %c0_i32 : i32
    %1 = arith.extui %0 : i1 to i32
    %c0_i32_0 = arith.constant 0 : i32
    %2 = arith.cmpi ne, %1, %c0_i32_0 : i32
    scf.if %2 {
      %c0_8 = arith.constant 0 : index
      %c0_9 = arith.constant 0 : index
      %11 = vector.load %arg2[%c0_8, %c0_9] : memref<8x8xi32, #tpu.memory_space<vmem>>, vector<8x8xi32>
      %12 = tpu.iota {dimensions = array<i32: 1>} : vector<8x256xi32>
      %false = arith.constant false
      %13 = vector.broadcast %false : i1 to vector<8x256xi1>
      %14 = vector.extract_strided_slice %11 {offsets = [0, 0], sizes = [8, 1], strides = [1, 1]} : vector<8x8xi32> to vector<8x1xi32>
      %15 = vector.broadcast %14 : vector<8x1xi32> to vector<8x256xi32>
      %16 = arith.cmpi eq, %15, %12 : vector<8x256xi32>
      %17 = arith.ori %13, %16 : vector<8x256xi1>
      %18 = vector.extract_strided_slice %11 {offsets = [0, 1], sizes = [8, 1], strides = [1, 1]} : vector<8x8xi32> to vector<8x1xi32>
      %19 = vector.broadcast %18 : vector<8x1xi32> to vector<8x256xi32>
      %20 = arith.cmpi eq, %19, %12 : vector<8x256xi32>
      %21 = arith.ori %17, %20 : vector<8x256xi1>
      %22 = vector.extract_strided_slice %11 {offsets = [0, 2], sizes = [8, 1], strides = [1, 1]} : vector<8x8xi32> to vector<8x1xi32>
      %23 = vector.broadcast %22 : vector<8x1xi32> to vector<8x256xi32>
      %24 = arith.cmpi eq, %23, %12 : vector<8x256xi32>
      %25 = arith.ori %21, %24 : vector<8x256xi1>
      %26 = vector.extract_strided_slice %11 {offsets = [0, 3], sizes = [8, 1], strides = [1, 1]} : vector<8x8xi32> to vector<8x1xi32>
      %27 = vector.broadcast %26 : vector<8x1xi32> to vector<8x256xi32>
      %28 = arith.cmpi eq, %27, %12 : vector<8x256xi32>
      %29 = arith.ori %25, %28 : vector<8x256xi1>
      %30 = vector.extract_strided_slice %11 {offsets = [0, 4], sizes = [8, 1], strides = [1, 1]} : vector<8x8xi32> to vector<8x1xi32>
      %31 = vector.broadcast %30 : vector<8x1xi32> to vector<8x256xi32>
      %32 = arith.cmpi eq, %31, %12 : vector<8x256xi32>
      %33 = arith.ori %29, %32 : vector<8x256xi1>
      %34 = vector.extract_strided_slice %11 {offsets = [0, 5], sizes = [8, 1], strides = [1, 1]} : vector<8x8xi32> to vector<8x1xi32>
      %35 = vector.broadcast %34 : vector<8x1xi32> to vector<8x256xi32>
      %36 = arith.cmpi eq, %35, %12 : vector<8x256xi32>
      %37 = arith.ori %33, %36 : vector<8x256xi1>
      %38 = vector.extract_strided_slice %11 {offsets = [0, 6], sizes = [8, 1], strides = [1, 1]} : vector<8x8xi32> to vector<8x1xi32>
      %39 = vector.broadcast %38 : vector<8x1xi32> to vector<8x256xi32>
      %40 = arith.cmpi eq, %39, %12 : vector<8x256xi32>
      %41 = arith.ori %37, %40 : vector<8x256xi1>
      %42 = vector.extract_strided_slice %11 {offsets = [0, 7], sizes = [8, 1], strides = [1, 1]} : vector<8x8xi32> to vector<8x1xi32>
      %43 = vector.broadcast %42 : vector<8x1xi32> to vector<8x256xi32>
      %44 = arith.cmpi eq, %43, %12 : vector<8x256xi32>
      %45 = arith.ori %41, %44 : vector<8x256xi1>
      %cst_10 = arith.constant 1.000000e+00 : f32
      %cst_11 = arith.constant 0.000000e+00 : f32
      %46 = vector.broadcast %cst_10 : f32 to vector<8x256xf32>
      %47 = vector.broadcast %cst_11 : f32 to vector<8x256xf32>
      %48 = arith.select %45, %46, %47 : vector<8x256xi1>, vector<8x256xf32>
      %49 = arith.truncf %48 : vector<8x256xf32> to vector<8x256xbf16>
      %c0_12 = arith.constant 0 : index
      %c0_13 = arith.constant 0 : index
      %50 = vector.load %arg3[%c0_12, %c0_13] : memref<256x64xbf16, #tpu.memory_space<vmem>>, vector<256x64xbf16>
      %cst_14 = arith.constant dense<0.000000e+00> : vector<8x64xf32>
      %51 = tpu.matmul %49, %50, %cst_14 {dimension_numbers = #tpu.dot_dimension_numbers<[1], [0], [0], [1], [0, 0, 1, 1], [], []>} : vector<8x256xbf16>, vector<256x64xbf16>, vector<8x64xf32> -> vector<8x64xf32>
      %c0_15 = arith.constant 0 : index
      %c0_16 = arith.constant 0 : index
      %52 = vector.load %arg4[%c0_15, %c0_16] : memref<1x64xf32, #tpu.memory_space<vmem>>, vector<1x64xf32>
      %53 = vector.broadcast %52 : vector<1x64xf32> to vector<8x64xf32>
      %54 = arith.addf %51, %53 : vector<8x64xf32>
      %cst_17 = arith.constant 0.000000e+00 : f32
      %55 = vector.broadcast %cst_17 : f32 to vector<8x64xf32>
      %56 = arith.maximumf %54, %55 : vector<8x64xf32>
      %c0_18 = arith.constant 0 : index
      %c0_19 = arith.constant 0 : index
      %57 = vector.load %arg8[%c0_18, %c0_19] : memref<8x64xf32, #tpu.memory_space<vmem>>, vector<8x64xf32>
      tpu.vector_store %arg8[%c0_18, %c0_19], %56 {strides = array<i32>} : memref<8x64xf32, #tpu.memory_space<vmem>>, vector<8x64xf32>,
    } else {
    }
    %c0 = arith.constant 0 : index
    %c0_1 = arith.constant 0 : index
    %3 = vector.load %arg8[%c0, %c0_1] : memref<8x64xf32, #tpu.memory_space<vmem>>, vector<8x64xf32>
    %4 = arith.truncf %3 : vector<8x64xf32> to vector<8x64xbf16>
    %c0_2 = arith.constant 0 : index
    %c0_3 = arith.constant 0 : index
    %5 = vector.load %arg5[%c0_2, %c0_3] : memref<64x256xbf16, #tpu.memory_space<vmem>>, vector<64x256xbf16>
    %cst = arith.constant dense<0.000000e+00> : vector<8x256xf32>
    %6 = tpu.matmul %4, %5, %cst {dimension_numbers = #tpu.dot_dimension_numbers<[1], [0], [0], [1], [0, 0, 1, 1], [], []>} : vector<8x64xbf16>, vector<64x256xbf16>, vector<8x256xf32> -> vector<8x256xf32>
    %c0_4 = arith.constant 0 : index
    %c0_5 = arith.constant 0 : index
    %7 = vector.load %arg6[%c0_4, %c0_5] : memref<1x256xf32, #tpu.memory_space<vmem>>, vector<1x256xf32>
    %8 = vector.broadcast %7 : vector<1x256xf32> to vector<8x256xf32>
    %9 = arith.addf %6, %8 : vector<8x256xf32>
    %c0_6 = arith.constant 0 : index
    %c0_7 = arith.constant 0 : index
    %10 = vector.load %arg7[%c0_6, %c0_7] : memref<8x256xf32, #tpu.memory_space<vmem>>, vector<8x256xf32>
    tpu.vector_store %arg7[%c0_6, %c0_7], %9 {strides = array<i32>} : memref<8x256xf32, #tpu.memory_space<vmem>>, vector<8x256xf32>,
    return
  }
  func.func @transform_0(%arg0: i32, %arg1: i32) -> (i32, i32) {
    %c0_i32 = arith.constant 0 : i32
    %c0_i32_0 = arith.constant 0 : i32
    return %arg0, %c0_i32 : i32, i32
  }
  func.func @transform_1(%arg0: i32, %arg1: i32) -> (i32, i32) {
    %c0_i32 = arith.constant 0 : i32
    %c0_i32_0 = arith.constant 0 : i32
    %c0_i32_1 = arith.constant 0 : i32
    return %c0_i32, %c0_i32_0 : i32, i32
  }
  func.func @transform_2(%arg0: i32, %arg1: i32) -> (i32, i32) {
    %c0_i32 = arith.constant 0 : i32
    %c0_i32_0 = arith.constant 0 : i32
    %c0_i32_1 = arith.constant 0 : i32
    return %c0_i32, %c0_i32_0 : i32, i32
  }
  func.func @transform_3(%arg0: i32, %arg1: i32) -> (i32, i32) {
    %c0_i32 = arith.constant 0 : i32
    %c0_i32_0 = arith.constant 0 : i32
    return %c0_i32, %arg1 : i32, i32
  }
  func.func @transform_4(%arg0: i32, %arg1: i32) -> (i32, i32) {
    %c0_i32 = arith.constant 0 : i32
    %c0_i32_0 = arith.constant 0 : i32
    return %c0_i32, %arg1 : i32, i32
  }
  func.func @transform_5(%arg0: i32, %arg1: i32) -> (i32, i32) {
    %c0_i32 = arith.constant 0 : i32
    return %arg0, %arg1 : i32, i32
  }
}

module attributes {stable_mosaic.version = 11 : i64} {
  func.func @mlp_kernel(%arg0: i32, %arg1: i32, %arg2: memref<8x8xi32, #tpu.memory_space<vmem>>, %arg3: memref<256x64xbf16, #tpu.memory_space<vmem>>, %arg4: memref<1x64xf32, #tpu.memory_space<vmem>>, %arg5: memref<64x256xbf16, #tpu.memory_space<vmem>>, %arg6: memref<1x256xf32, #tpu.memory_space<vmem>>, %arg7: memref<8x256xf32, #tpu.memory_space<vmem>>, %arg8: memref<8x64xf32, #tpu.memory_space<vmem>>) attributes {dimension_semantics = [#tpu.dimension_semantics<parallel>, #tpu.dimension_semantics<arbitrary>], iteration_bounds = array<i64: 1, 1>, scalar_prefetch = 0 : i64, scratch_operands = 1 : i64, tpu.core_type = #tpu.core_type<tc>, window_params = [{transform_indices = @transform_0, window_bounds = array<i64: 8, 8>}, {pipeline_mode = #tpu.pipeline_mode<synchronous>, transform_indices = @transform_1, window_bounds = array<i64: 256, 64>}, {pipeline_mode = #tpu.pipeline_mode<synchronous>, transform_indices = @transform_2, window_bounds = array<i64: 1, 64>}, {transform_indices = @transform_3, window_bounds = array<i64: 64, 256>}, {transform_indices = @transform_4, window_bounds = array<i64: 1, 256>}, {transform_indices = @transform_5, window_bounds = array<i64: 8, 256>}]} {
    %c0_i32 = arith.constant 0 : i32
    %0 = arith.cmpi eq, %arg1, %c0_i32 : i32
    %1 = arith.extui %0 : i1 to i32
    %c0_i32_0 = arith.constant 0 : i32
    %2 = arith.cmpi ne, %1, %c0_i32_0 : i32
    scf.if %2 {
      %c0_8 = arith.constant 0 : index
      %c0_9 = arith.constant 0 : index
      %11 = vector.load %arg2[%c0_8, %c0_9] : memref<8x8xi32, #tpu.memory_space<vmem>>, vector<8x8xi32>
      %12 = tpu.iota {dimensions = array<i32: 1>} : vector<8x256xi32>
      %false = arith.constant false
      %13 = vector.broadcast %false : i1 to vector<8x256xi1>
      %14 = vector.extract_strided_slice %11 {offsets = [0, 0], sizes = [8, 1], strides = [1, 1]} : vector<8x8xi32> to vector<8x1xi32>
      %15 = vector.broadcast %14 : vector<8x1xi32> to vector<8x256xi32>
      %16 = arith.cmpi eq, %15, %12 : vector<8x256xi32>
      %17 = arith.ori %13, %16 : vector<8x256xi1>
      %18 = vector.extract_strided_slice %11 {offsets = [0, 1], sizes = [8, 1], strides = [1, 1]} : vector<8x8xi32> to vector<8x1xi32>
      %19 = vector.broadcast %18 : vector<8x1xi32> to vector<8x256xi32>
      %20 = arith.cmpi eq, %19, %12 : vector<8x256xi32>
      %21 = arith.ori %17, %20 : vector<8x256xi1>
      %22 = vector.extract_strided_slice %11 {offsets = [0, 2], sizes = [8, 1], strides = [1, 1]} : vector<8x8xi32> to vector<8x1xi32>
      %23 = vector.broadcast %22 : vector<8x1xi32> to vector<8x256xi32>
      %24 = arith.cmpi eq, %23, %12 : vector<8x256xi32>
      %25 = arith.ori %21, %24 : vector<8x256xi1>
      %26 = vector.extract_strided_slice %11 {offsets = [0, 3], sizes = [8, 1], strides = [1, 1]} : vector<8x8xi32> to vector<8x1xi32>
      %27 = vector.broadcast %26 : vector<8x1xi32> to vector<8x256xi32>
      %28 = arith.cmpi eq, %27, %12 : vector<8x256xi32>
      %29 = arith.ori %25, %28 : vector<8x256xi1>
      %30 = vector.extract_strided_slice %11 {offsets = [0, 4], sizes = [8, 1], strides = [1, 1]} : vector<8x8xi32> to vector<8x1xi32>
      %31 = vector.broadcast %30 : vector<8x1xi32> to vector<8x256xi32>
      %32 = arith.cmpi eq, %31, %12 : vector<8x256xi32>
      %33 = arith.ori %29, %32 : vector<8x256xi1>
      %34 = vector.extract_strided_slice %11 {offsets = [0, 5], sizes = [8, 1], strides = [1, 1]} : vector<8x8xi32> to vector<8x1xi32>
      %35 = vector.broadcast %34 : vector<8x1xi32> to vector<8x256xi32>
      %36 = arith.cmpi eq, %35, %12 : vector<8x256xi32>
      %37 = arith.ori %33, %36 : vector<8x256xi1>
      %38 = vector.extract_strided_slice %11 {offsets = [0, 6], sizes = [8, 1], strides = [1, 1]} : vector<8x8xi32> to vector<8x1xi32>
      %39 = vector.broadcast %38 : vector<8x1xi32> to vector<8x256xi32>
      %40 = arith.cmpi eq, %39, %12 : vector<8x256xi32>
      %41 = arith.ori %37, %40 : vector<8x256xi1>
      %42 = vector.extract_strided_slice %11 {offsets = [0, 7], sizes = [8, 1], strides = [1, 1]} : vector<8x8xi32> to vector<8x1xi32>
      %43 = vector.broadcast %42 : vector<8x1xi32> to vector<8x256xi32>
      %44 = arith.cmpi eq, %43, %12 : vector<8x256xi32>
      %45 = arith.ori %41, %44 : vector<8x256xi1>
      %cst_10 = arith.constant 1.000000e+00 : f32
      %cst_11 = arith.constant 0.000000e+00 : f32
      %46 = vector.broadcast %cst_10 : f32 to vector<8x256xf32>
      %47 = vector.broadcast %cst_11 : f32 to vector<8x256xf32>
      %48 = arith.select %45, %46, %47 : vector<8x256xi1>, vector<8x256xf32>
      %49 = arith.truncf %48 : vector<8x256xf32> to vector<8x256xbf16>
      %c0_12 = arith.constant 0 : index
      %c0_13 = arith.constant 0 : index
      %50 = vector.load %arg3[%c0_12, %c0_13] : memref<256x64xbf16, #tpu.memory_space<vmem>>, vector<256x64xbf16>
      %cst_14 = arith.constant dense<0.000000e+00> : vector<8x64xf32>
      %51 = tpu.matmul %49, %50, %cst_14 {dimension_numbers = #tpu.dot_dimension_numbers<[1], [0], [0], [1], [0, 0, 1, 1], [], []>} : vector<8x256xbf16>, vector<256x64xbf16>, vector<8x64xf32> -> vector<8x64xf32>
      %c0_15 = arith.constant 0 : index
      %c0_16 = arith.constant 0 : index
      %52 = vector.load %arg4[%c0_15, %c0_16] : memref<1x64xf32, #tpu.memory_space<vmem>>, vector<1x64xf32>
      %53 = vector.broadcast %52 : vector<1x64xf32> to vector<8x64xf32>
      %54 = arith.addf %51, %53 : vector<8x64xf32>
      %cst_17 = arith.constant 0.000000e+00 : f32
      %55 = vector.broadcast %cst_17 : f32 to vector<8x64xf32>
      %56 = arith.maximumf %54, %55 : vector<8x64xf32>
      %c0_18 = arith.constant 0 : index
      %c0_19 = arith.constant 0 : index
      %57 = vector.load %arg8[%c0_18, %c0_19] : memref<8x64xf32, #tpu.memory_space<vmem>>, vector<8x64xf32>
      tpu.vector_store %arg8[%c0_18, %c0_19], %56 {strides = array<i32>} : memref<8x64xf32, #tpu.memory_space<vmem>>, vector<8x64xf32>,
    } else {
    }
    %c0 = arith.constant 0 : index
    %c0_1 = arith.constant 0 : index
    %3 = vector.load %arg8[%c0, %c0_1] : memref<8x64xf32, #tpu.memory_space<vmem>>, vector<8x64xf32>
    %4 = arith.truncf %3 : vector<8x64xf32> to vector<8x64xbf16>
    %c0_2 = arith.constant 0 : index
    %c0_3 = arith.constant 0 : index
    %5 = vector.load %arg5[%c0_2, %c0_3] : memref<64x256xbf16, #tpu.memory_space<vmem>>, vector<64x256xbf16>
    %cst = arith.constant dense<0.000000e+00> : vector<8x256xf32>
    %6 = tpu.matmul %4, %5, %cst {dimension_numbers = #tpu.dot_dimension_numbers<[1], [0], [0], [1], [0, 0, 1, 1], [], []>} : vector<8x64xbf16>, vector<64x256xbf16>, vector<8x256xf32> -> vector<8x256xf32>
    %c0_4 = arith.constant 0 : index
    %c0_5 = arith.constant 0 : index
    %7 = vector.load %arg6[%c0_4, %c0_5] : memref<1x256xf32, #tpu.memory_space<vmem>>, vector<1x256xf32>
    %8 = vector.broadcast %7 : vector<1x256xf32> to vector<8x256xf32>
    %9 = arith.addf %6, %8 : vector<8x256xf32>
    %c0_6 = arith.constant 0 : index
    %c0_7 = arith.constant 0 : index
    %10 = vector.load %arg7[%c0_6, %c0_7] : memref<8x256xf32, #tpu.memory_space<vmem>>, vector<8x256xf32>
    tpu.vector_store %arg7[%c0_6, %c0_7], %9 {strides = array<i32>} : memref<8x256xf32, #tpu.memory_space<vmem>>, vector<8x256xf32>,
    return
  }
  func.func @transform_0(%arg0: i32, %arg1: i32) -> (i32, i32) {
    %c0_i32 = arith.constant 0 : i32
    %c0_i32_0 = arith.constant 0 : i32
    return %arg0, %c0_i32 : i32, i32
  }
  func.func @transform_1(%arg0: i32, %arg1: i32) -> (i32, i32) {
    %c0_i32 = arith.constant 0 : i32
    %c0_i32_0 = arith.constant 0 : i32
    %c0_i32_1 = arith.constant 0 : i32
    return %c0_i32, %c0_i32_0 : i32, i32
  }
  func.func @transform_2(%arg0: i32, %arg1: i32) -> (i32, i32) {
    %c0_i32 = arith.constant 0 : i32
    %c0_i32_0 = arith.constant 0 : i32
    %c0_i32_1 = arith.constant 0 : i32
    return %c0_i32, %c0_i32_0 : i32, i32
  }
  func.func @transform_3(%arg0: i32, %arg1: i32) -> (i32, i32) {
    %c0_i32 = arith.constant 0 : i32
    %c0_i32_0 = arith.constant 0 : i32
    return %c0_i32, %arg1 : i32, i32
  }
  func.func @transform_4(%arg0: i32, %arg1: i32) -> (i32, i32) {
    %c0_i32 = arith.constant 0 : i32
    %c0_i32_0 = arith.constant 0 : i32
    return %c0_i32, %arg1 : i32, i32
  }
  func.func @transform_5(%arg0: i32, %arg1: i32) -> (i32, i32) {
    %c0_i32 = arith.constant 0 : i32
    return %arg0, %arg1 : i32, i32
  }
}

</mosaic_0001>

<bundles_post_ra>
// kernel: tpu_custom_call.1
= control target key start
LH: loop header
LB: loop body
LE: loop exit
PB: predicated region body
PF: predicated region fallthrough
CT: control target
= control target key end

     0   :  { %v508_v2 = vmov 2   ;;  %v509_v3 = vmov 0   ;;  %v510_v7 = vmov 3   ;;  %v511_v8 = vmov 1   ;;  %s643_s0 = inlined_call_operand.vmem [shape: s32[8,8], index: 0, kind: input, shape index: {}]   ;;  %s644_s1 = inlined_call_operand.vmem [shape: bf16[256,64], index: 1, kind: input, shape index: {}]   ;;  %s645_s2 = inlined_call_operand.vmem [shape: f32[1,64], index: 2, kind: input, shape index: {}]   ;;  %s646_s3 = inlined_call_operand.vmem [shape: bf16[64,256], index: 3, kind: input, shape index: {}]   ;;  %s647_s4 = inlined_call_operand.vmem [shape: f32[1,256], index: 4, kind: input, shape index: {}]   ;;  %s648_s5 = inlined_call_operand.hbm [shape: f32[8,256], index: 5, kind: output, shape index: {}]  }
   0x1   :  { %v26_v0 = vld [vmem:[%s643_s0] sm:$0xff]  ;;  %449 = vset.pattern.permute.xlu1 %v508_v2  ;;  %447 = vset.pattern.permute.xlu0 %v509_v3  ;;  %v458_v5 = vld [vmem:[%s644_s1 + $0x48] sm:$0xff]   ;;  %v460_v9 = vld [vmem:[%s644_s1 + $0x50] sm:$0xff]   ;;  %v512_v12 = vmov 4   ;;  %v513_v13 = vmov 5   ;;  %v514_v16 = vmov 6  }
   0x2   :  { %v456_v1 = vld [vmem:[%s644_s1 + $0x40] sm:$0xff]   ;;  %43 = vperm.xlu1 %449, %v26_v0   ;;  %31 = vperm.xlu0 %447, %v26_v0   ;;  %v459_v6 = vld [vmem:[%s644_s1 + $0x8] sm:$0xff]   ;;  %v461_v10 = vld [vmem:[%s644_s1 + $0x10] sm:$0xff]   ;;  %v515_v17 = vmov 7  }
   0x3   :  { %415 = vmatprep.subr.bf16.mxu0 %v456_v1  ;;  %v457_v4 = vld [vmem:[%s644_s1] sm:$0xff]   ;;  %364 = vmatprep.mubr.bf16.mxu1 %v509_v3  ;;  %v462_v11 = vld [vmem:[%s644_s1 + $0x58] sm:$0xff]   ;;  %v466_v19 = vld [vmem:[%s644_s1 + $0x68] sm:$0xff]  }
   0x4   :  { %416 = vmatpush3.bf16.msra.mxu0 %v457_v4  ;;  %v463_v14 = vld [vmem:[%s644_s1 + $0x18] sm:$0xff]   ;;  %v464_v15 = vld [vmem:[%s644_s1 + $0x60] sm:$0xff]  }
   0x5   :  { %417 = vmatprep.subr.bf16.mxu0 %v458_v5  ;;  %v465_v18 = vld [vmem:[%s644_s1 + $0x20] sm:$0xff]  }
   0x6   :  { %450 = vset.pattern.permute.xlu1 %v510_v7  ;;  %448 = vset.pattern.permute.xlu0 %v511_v8 }
   0x7   :  { %50 = vperm.xlu1 %450, %v26_v0   ;;  %36 = vperm.xlu0 %448, %v26_v0  }
   0x8   :  { %418 = vmatpush3.bf16.msra.mxu0 %v459_v6 }
   0x9   :  { %419 = vmatprep.subr.bf16.mxu0 %v460_v9 }
   0xb   :  { %451 = vset.pattern.permute.xlu1 %v512_v12  ;;  %452 = vset.pattern.permute.xlu0 %v513_v13 }
   0xc   :  { %57 = vperm.xlu1 %451, %v26_v0   ;;  %64 = vperm.xlu0 %452, %v26_v0  }
   0xd   :  { %420 = vmatpush3.bf16.msra.mxu0 %v461_v10 }
   0xe   :  { %421 = vmatprep.subr.bf16.mxu0 %v462_v11 }
  0x10   :  { %453 = vset.pattern.permute.xlu1 %v514_v16  ;;  %455 = vset.pattern.permute.xlu0 %v515_v17 }
  0x11   :  { %71 = vperm.xlu1 %453, %v26_v0   ;;  %422 = vmatpush3.bf16.msra.mxu0 %v463_v14 }
  0x12   :  { %423 = vmatprep.subr.bf16.mxu0 %v464_v15 }
  0x13   :  { %10 = vsyncpa [#allocation4], 0  ;;  %v467_v20 = vld [vmem:[%s644_s1 + $0x28] sm:$0xff]   ;;  %v468_v21 = vld [vmem:[%s644_s1 + $0x70] sm:$0xff]   ;;  %v27_v25 = vlaneseq  ;;  %v516_v36 = vmov 0.0  }
  0x14   :  { %v469_v22 = vld [vmem:[%s644_s1 + $0x30] sm:$0xff]   ;;  %v470_v23 = vld [vmem:[%s644_s1 + $0x78] sm:$0xff]   ;;  %v472_v41 = vld [vmem:[%s646_s3 + $0x4] ss:$8 sps:$4 sm:$0xff]  }
  0x15   :  { %454 = vset.pattern.permute.xlu1 %v515_v17  ;;  %424 = vmatpush3.bf16.msra.mxu0 %v465_v18  ;;  %v471_v24 = vld [vmem:[%s644_s1 + $0x38] sm:$0xff]   ;;  %v28_v26 = vand.u32 127, %v27_v25  ;;  %v474_v42 = vld [vmem:[%s646_s3] ss:$8 sps:$4 sm:$0xff]   ;;  %v478_v45 = vld [vmem:[%s646_s3 + $0x24] ss:$8 sps:$4 sm:$0xff]  }
  0x16   :  { %78 = vperm.xlu1 %454, %v26_v0   ;;  %425 = vmatprep.subr.bf16.mxu0 %v466_v19  ;;  %v475_v43 = vld [vmem:[%s646_s3 + $0x14] ss:$8 sps:$4 sm:$0xff]   ;;  %v477_v44 = vld [vmem:[%s646_s3 + $0x10] ss:$8 sps:$4 sm:$0xff]   ;;  %v480_v46 = vld [vmem:[%s646_s3 + $0x20] ss:$8 sps:$4 sm:$0xff]  }
  0x17   :  { %v29_v29 = vadd.s32 128, %v28_v26  ;;  %332 = vmatprep.subr.bf16.mxu1 %v472_v41  ;;  %v481_v47 = vld [vmem:[%s646_s3 + $0x34] ss:$8 sps:$4 sm:$0xff]   ;;  %v483_v48 = vld [vmem:[%s646_s3 + $0x30] ss:$8 sps:$4 sm:$0xff]   ;;  %v279_v59 = vshrl.u32 %v27_v25, 7 }
  0x18   :  { %333 = vmatpush1.bf16.msra.mxu1 %v474_v42  ;;  %v389_v50 = vld [vmem:[%s645_s2] ss:$0 sm:$0xff]  ;;  %s517_s2 = smov [#allocation3]  }
  0x19   :  { %426 = vmatpush3.bf16.msra.mxu0 %v467_v20  ;;  %334 = vmatprep.subr.bf16.mxu1 %v475_v43  ;;  %v280_v60 = vsub.s32 0, %v279_v59  ;;  %v276_v61 = vld [vmem:[%s647_s4] sm:$0x3]  ;;  %v284_v62 = vsub.s32 1, %v279_v59  ;;  %s381_s18 = sshll.u32 %s517_s2, 4  ;;  %s382_s18 = int_to_ptr.vmem [resolvable:$true] %s381_s18 }
  0x1a   :  { %427 = vmatprep.subr.bf16.mxu0 %v468_v21  ;;  %s484_s19 = scalar_lea.vmem %s382_s18, 256  ;;  %p489_p1 = scmp.lt.s32.totalorder %s382_s18, %s382_s18 }
  0x1b   :  { %v281_v63 = vrot.slane %v276_v61, %v280_v60  ;;  %v285_v0 = vrot.slane %v276_v61, %v284_v62  ;;  %p485_p0 = scmp.ne.s32.totalorder %s382_s18, %s484_s19  ;;  %p490_p2 = scmp.lt.s32.totalorder %s484_s19, %s484_s19 }
  0x1c   :  { %335 = vmatpush1.bf16.msra.mxu1 %v477_v44 }
  0x1d   :  { %428 = vmatpush3.bf16.msra.mxu0 %v469_v22  ;;  %336 = vmatprep.subr.bf16.mxu1 %v478_v45  ;;  %p491_p3 = por %p490_p2, %p489_p1 }
  0x1e   :  { %429 = vmatprep.subr.bf16.mxu0 %v470_v23 }
  0x1f   :  { %p492_p4 = pnand %p491_p3, %p485_p0 }
  0x20   :  { %337 = vmatpush1.bf16.msra.mxu1 %v480_v46 }
  0x21   :  { %430 = vmatpush3.bf16.msra.mxu0 %v471_v24  ;;  %338 = vmatprep.subr.bf16.mxu1 %v481_v47 }
  0x24   :  { %339 = vmatpush1.bf16.msra.mxu1 %v483_v48 }
  0x81   :  { %v44_v27 = vpop.permute.xlu1 %43  ;;  %v32_v28 = vpop.permute.xlu0 %31 }
  0x82   :  { %vm33_vm0 = vcmp.eq.s32.totalorder %v32_v28, %v28_v26  ;;  %vm34_vm1 = vcmp.eq.s32.totalorder %v32_v28, %v29_v29  ;;  %vm45_vm6 = vcmp.eq.s32.totalorder %v44_v27, %v28_v26  ;;  %vm46_vm7 = vcmp.eq.s32.totalorder %v44_v27, %v29_v29 }
  0x86   :  { %v51_v30 = vpop.permute.xlu1 %50  ;;  %v37_v31 = vpop.permute.xlu0 %36 }
  0x87   :  { %vm38_vm2 = vcmp.eq.s32.totalorder %v37_v31, %v28_v26  ;;  %vm39_vm3 = vcmp.eq.s32.totalorder %v37_v31, %v29_v29  ;;  %vm52_vm10 = vcmp.eq.s32.totalorder %v51_v30, %v28_v26  ;;  %vm53_vm12 = vcmp.eq.s32.totalorder %v51_v30, %v29_v29 }
  0x88   :  { %vm40_vm4 = vmor %vm33_vm0, %vm38_vm2 }
  0x89   :  { %vm41_vm5 = vmor %vm34_vm1, %vm39_vm3 }
  0x8a   :  { %vm47_vm8 = vmor %vm40_vm4, %vm45_vm6 }
  0x8b   :  { %v58_v32 = vpop.permute.xlu1 %57  ;;  %vm48_vm9 = vmor %vm41_vm5, %vm46_vm7  ;;  %v65_v33 = vpop.permute.xlu0 %64 }
  0x8c   :  { %vm59_vm11 = vcmp.eq.s32.totalorder %v58_v32, %v28_v26  ;;  %vm60_vm13 = vcmp.eq.s32.totalorder %v58_v32, %v29_v29  ;;  %vm54_vm14 = vmor %vm47_vm8, %vm52_vm10  ;;  %vm66_vm2 = vcmp.eq.s32.totalorder %v65_v33, %v28_v26  ;;  %vm67_vm3 = vcmp.eq.s32.totalorder %v65_v33, %v29_v29 }
  0x8d   :  { %vm55_vm15 = vmor %vm48_vm9, %vm53_vm12 }
  0x8e   :  { %vm61_vm0 = vmor %vm54_vm14, %vm59_vm11 }
  0x8f   :  { %vm62_vm1 = vmor %vm55_vm15, %vm60_vm13  ;;  %vm264_vm13 = vcmask 523264  }
  0x90   :  { %v72_v34 = vpop.permute.xlu1 %71  ;;  %vm68_vm6 = vmor %vm61_vm0, %vm66_vm2 }
  0x91   :  { %vm73_vm4 = vcmp.eq.s32.totalorder %v72_v34, %v28_v26  ;;  %vm74_vm5 = vcmp.eq.s32.totalorder %v72_v34, %v29_v29  ;;  %vm69_vm7 = vmor %vm62_vm1, %vm67_vm3 }
  0x92   :  { %vm75_vm8 = vmor %vm68_vm6, %vm73_vm4 }
  0x93   :  { %vm76_vm12 = vmor %vm69_vm7, %vm74_vm5 }
  0x95   :  { %v79_v35 = vpop.permute.xlu1 %78 }
  0x96   :  { %vm80_vm10 = vcmp.eq.s32.totalorder %v79_v35, %v28_v26  ;;  %vm81_vm9 = vcmp.eq.s32.totalorder %v79_v35, %v29_v29 }
  0x97   :  { %vm82_vm11 = vmor %vm75_vm8, %vm80_vm10 }
  0x98   :  { %vm83_vm14 = vmor %vm76_vm12, %vm81_vm9  ;;  %v84_v37 = vsel %vm82_vm11, 1.0, %v516_v36 }
  0x99   :  { %v85_v38 = vsel %vm83_vm14, 1.0, %v516_v36  ;;  %v86_v39 = vpack.c.bf16 %v84_v37, %v84_v37 }
  0x9a   :  { %v87_v40 = vpack.c.bf16 %v85_v38, %v85_v38 }
  0x9c   :  { %255 = vmatprep.mubr.bf16.mxu0 %v87_v40 }
  0x9d   :  { %256 = vmatmul.mubr.bf16.vlgmr.msra.gmra.mrb[0].mxu0 %v86_v39 }
 0x170   :  { %v431_v49 = vpop.f32.mrb[0].mxu0 }
 0x171   :  { %v432_v51 = vpop.f32.mrb[1].mxu0 }
 0x172   :  { %v433_v52 = vadd.f32 %v432_v51, %v431_v49  ;;  %v434_v53 = vpop.f32.mrb[2].mxu0 }
 0x173   :  { %v435_v54 = vpop.f32.mrb[3].mxu0 }
 0x174   :  { %v258_v55 = vadd.f32 %v433_v52, %v389_v50 }
 0x176   :  { %v263_v56 = vmax.f32 %v258_v55, 0.0 }
 0x178   :  { %265 = vst.msk [vmem:[#allocation2] sm:$0xff] %vm264_vm13, %v263_v56 }
 0x17f   :  { %v266_v57 = vld [vmem:[#allocation2] sm:$0xff] }
 0x180   :  { %v267_v58 = vpack.c.bf16 %v266_v57, %v266_v57 }
 0x182   :  { %414 = vmatmul.mubr.msk.bf16.vlgmr.msra.gmra.mrb[0].mxu1 %vm264_vm13, %v267_v58 }
 0x255   :  { %v366_v1 = vpop.f32.mrb[0].mxu1 }
 0x256   :  { %v367_v2 = vadd.f32 %v366_v1, %v281_v63  ;;  %v368_v3 = vpop.f32.mrb[1].mxu1 }
 0x257   :  { %v369_v4 = vadd.f32 %v368_v3, %v285_v0  ;;  %v370_v5 = vpop.f32.mrb[2].mxu1 }
 0x258   :  { %373 = vst [vmem:[#allocation3] sm:$0xff] %v367_v2  ;;  %v371_v6 = vpop.f32.mrb[3].mxu1 }
 0x259   :  { %374 = vst [vmem:[#allocation3 + $0x8] sm:$0xff] %v369_v4 }
 0x25a   :  { %495 = shalt.err (!%p492_p4)
}
 0x25b   :  { %s496_s21 = scalar_lea.hbm %s648_s5, 256 }
 0x25c   :  { %p497_p5 = scmp.ne.s32.totalorder %s648_s5, %s496_s21  ;;  %p500_p6 = scmp.lt.u32.totalorder %s496_s21, %s648_s5 }
 0x25e   :  { %p502_p7 = pnand %p500_p6, %p497_p5 }
 0x260   :  { %505 = shalt.err (!%p502_p7)
}
 0x261   :  { %384 = dma.vmem_to_hbm [thread:$0]  %s382_s18, 256, %s648_s5, [#allocation4]  }
 0x262   :  { %506 = dma.done.wait [#allocation4], 256  }
 0x263   :  { %507 = vsyncadd [#allocation4], 4294967040 }
 0x264   :  { %388 = vsyncpa [#allocation4], 1 }

// kernel: tpu_custom_call.1
= control target key start
LH: loop header
LB: loop body
LE: loop exit
PB: predicated region body
PF: predicated region fallthrough
CT: control target
= control target key end

     0   :  { %v508_v2 = vmov 2   ;;  %v509_v3 = vmov 0   ;;  %v510_v7 = vmov 3   ;;  %v511_v8 = vmov 1   ;;  %s643_s0 = inlined_call_operand.vmem [shape: s32[8,8], index: 0, kind: input, shape index: {}]   ;;  %s644_s1 = inlined_call_operand.vmem [shape: bf16[256,64], index: 1, kind: input, shape index: {}]   ;;  %s645_s2 = inlined_call_operand.vmem [shape: f32[1,64], index: 2, kind: input, shape index: {}]   ;;  %s646_s3 = inlined_call_operand.vmem [shape: bf16[64,256], index: 3, kind: input, shape index: {}]   ;;  %s647_s4 = inlined_call_operand.vmem [shape: f32[1,256], index: 4, kind: input, shape index: {}]   ;;  %s648_s5 = inlined_call_operand.hbm [shape: f32[8,256], index: 5, kind: output, shape index: {}]  }
   0x1   :  { %v26_v0 = vld [vmem:[%s643_s0] sm:$0xff]  ;;  %449 = vset.pattern.permute.xlu1 %v508_v2  ;;  %447 = vset.pattern.permute.xlu0 %v509_v3  ;;  %v458_v5 = vld [vmem:[%s644_s1 + $0x48] sm:$0xff]   ;;  %v460_v9 = vld [vmem:[%s644_s1 + $0x50] sm:$0xff]   ;;  %v512_v12 = vmov 4   ;;  %v513_v13 = vmov 5   ;;  %v514_v16 = vmov 6  }
   0x2   :  { %v456_v1 = vld [vmem:[%s644_s1 + $0x40] sm:$0xff]   ;;  %43 = vperm.xlu1 %449, %v26_v0   ;;  %31 = vperm.xlu0 %447, %v26_v0   ;;  %v459_v6 = vld [vmem:[%s644_s1 + $0x8] sm:$0xff]   ;;  %v461_v10 = vld [vmem:[%s644_s1 + $0x10] sm:$0xff]   ;;  %v515_v17 = vmov 7  }
   0x3   :  { %415 = vmatprep.subr.bf16.mxu0 %v456_v1  ;;  %v457_v4 = vld [vmem:[%s644_s1] sm:$0xff]   ;;  %364 = vmatprep.mubr.bf16.mxu1 %v509_v3  ;;  %v462_v11 = vld [vmem:[%s644_s1 + $0x58] sm:$0xff]   ;;  %v466_v19 = vld [vmem:[%s644_s1 + $0x68] sm:$0xff]  }
   0x4   :  { %416 = vmatpush3.bf16.msra.mxu0 %v457_v4  ;;  %v463_v14 = vld [vmem:[%s644_s1 + $0x18] sm:$0xff]   ;;  %v464_v15 = vld [vmem:[%s644_s1 + $0x60] sm:$0xff]  }
   0x5   :  { %417 = vmatprep.subr.bf16.mxu0 %v458_v5  ;;  %v465_v18 = vld [vmem:[%s644_s1 + $0x20] sm:$0xff]  }
   0x6   :  { %450 = vset.pattern.permute.xlu1 %v510_v7  ;;  %448 = vset.pattern.permute.xlu0 %v511_v8 }
   0x7   :  { %50 = vperm.xlu1 %450, %v26_v0   ;;  %36 = vperm.xlu0 %448, %v26_v0  }
   0x8   :  { %418 = vmatpush3.bf16.msra.mxu0 %v459_v6 }
   0x9   :  { %419 = vmatprep.subr.bf16.mxu0 %v460_v9 }
   0xb   :  { %451 = vset.pattern.permute.xlu1 %v512_v12  ;;  %452 = vset.pattern.permute.xlu0 %v513_v13 }
   0xc   :  { %57 = vperm.xlu1 %451, %v26_v0   ;;  %64 = vperm.xlu0 %452, %v26_v0  }
   0xd   :  { %420 = vmatpush3.bf16.msra.mxu0 %v461_v10 }
   0xe   :  { %421 = vmatprep.subr.bf16.mxu0 %v462_v11 }
  0x10   :  { %453 = vset.pattern.permute.xlu1 %v514_v16  ;;  %455 = vset.pattern.permute.xlu0 %v515_v17 }
  0x11   :  { %71 = vperm.xlu1 %453, %v26_v0   ;;  %422 = vmatpush3.bf16.msra.mxu0 %v463_v14 }
  0x12   :  { %423 = vmatprep.subr.bf16.mxu0 %v464_v15 }
  0x13   :  { %10 = vsyncpa [#allocation4], 0  ;;  %v467_v20 = vld [vmem:[%s644_s1 + $0x28] sm:$0xff]   ;;  %v468_v21 = vld [vmem:[%s644_s1 + $0x70] sm:$0xff]   ;;  %v27_v25 = vlaneseq  ;;  %v516_v36 = vmov 0.0  }
  0x14   :  { %v469_v22 = vld [vmem:[%s644_s1 + $0x30] sm:$0xff]   ;;  %v470_v23 = vld [vmem:[%s644_s1 + $0x78] sm:$0xff]   ;;  %v472_v41 = vld [vmem:[%s646_s3 + $0x4] ss:$8 sps:$4 sm:$0xff]  }
  0x15   :  { %454 = vset.pattern.permute.xlu1 %v515_v17  ;;  %424 = vmatpush3.bf16.msra.mxu0 %v465_v18  ;;  %v471_v24 = vld [vmem:[%s644_s1 + $0x38] sm:$0xff]   ;;  %v28_v26 = vand.u32 127, %v27_v25  ;;  %v474_v42 = vld [vmem:[%s646_s3] ss:$8 sps:$4 sm:$0xff]   ;;  %v478_v45 = vld [vmem:[%s646_s3 + $0x24] ss:$8 sps:$4 sm:$0xff]  }
  0x16   :  { %78 = vperm.xlu1 %454, %v26_v0   ;;  %425 = vmatprep.subr.bf16.mxu0 %v466_v19  ;;  %v475_v43 = vld [vmem:[%s646_s3 + $0x14] ss:$8 sps:$4 sm:$0xff]   ;;  %v477_v44 = vld [vmem:[%s646_s3 + $0x10] ss:$8 sps:$4 sm:$0xff]   ;;  %v480_v46 = vld [vmem:[%s646_s3 + $0x20] ss:$8 sps:$4 sm:$0xff]  }
  0x17   :  { %v29_v29 = vadd.s32 128, %v28_v26  ;;  %332 = vmatprep.subr.bf16.mxu1 %v472_v41  ;;  %v481_v47 = vld [vmem:[%s646_s3 + $0x34] ss:$8 sps:$4 sm:$0xff]   ;;  %v483_v48 = vld [vmem:[%s646_s3 + $0x30] ss:$8 sps:$4 sm:$0xff]   ;;  %v279_v59 = vshrl.u32 %v27_v25, 7 }
  0x18   :  { %333 = vmatpush1.bf16.msra.mxu1 %v474_v42  ;;  %v389_v50 = vld [vmem:[%s645_s2] ss:$0 sm:$0xff]  ;;  %s517_s2 = smov [#allocation3]  }
  0x19   :  { %426 = vmatpush3.bf16.msra.mxu0 %v467_v20  ;;  %334 = vmatprep.subr.bf16.mxu1 %v475_v43  ;;  %v280_v60 = vsub.s32 0, %v279_v59  ;;  %v276_v61 = vld [vmem:[%s647_s4] sm:$0x3]  ;;  %v284_v62 = vsub.s32 1, %v279_v59  ;;  %s381_s18 = sshll.u32 %s517_s2, 4  ;;  %s382_s18 = int_to_ptr.vmem [resolvable:$true] %s381_s18 }
  0x1a   :  { %427 = vmatprep.subr.bf16.mxu0 %v468_v21  ;;  %s484_s19 = scalar_lea.vmem %s382_s18, 256  ;;  %p489_p1 = scmp.lt.s32.totalorder %s382_s18, %s382_s18 }
  0x1b   :  { %v281_v63 = vrot.slane %v276_v61, %v280_v60  ;;  %v285_v0 = vrot.slane %v276_v61, %v284_v62  ;;  %p485_p0 = scmp.ne.s32.totalorder %s382_s18, %s484_s19  ;;  %p490_p2 = scmp.lt.s32.totalorder %s484_s19, %s484_s19 }
  0x1c   :  { %335 = vmatpush1.bf16.msra.mxu1 %v477_v44 }
  0x1d   :  { %428 = vmatpush3.bf16.msra.mxu0 %v469_v22  ;;  %336 = vmatprep.subr.bf16.mxu1 %v478_v45  ;;  %p491_p3 = por %p490_p2, %p489_p1 }
  0x1e   :  { %429 = vmatprep.subr.bf16.mxu0 %v470_v23 }
  0x1f   :  { %p492_p4 = pnand %p491_p3, %p485_p0 }
  0x20   :  { %337 = vmatpush1.bf16.msra.mxu1 %v480_v46 }
  0x21   :  { %430 = vmatpush3.bf16.msra.mxu0 %v471_v24  ;;  %338 = vmatprep.subr.bf16.mxu1 %v481_v47 }
  0x24   :  { %339 = vmatpush1.bf16.msra.mxu1 %v483_v48 }
  0x81   :  { %v44_v27 = vpop.permute.xlu1 %43  ;;  %v32_v28 = vpop.permute.xlu0 %31 }
  0x82   :  { %vm33_vm0 = vcmp.eq.s32.totalorder %v32_v28, %v28_v26  ;;  %vm34_vm1 = vcmp.eq.s32.totalorder %v32_v28, %v29_v29  ;;  %vm45_vm6 = vcmp.eq.s32.totalorder %v44_v27, %v28_v26  ;;  %vm46_vm7 = vcmp.eq.s32.totalorder %v44_v27, %v29_v29 }
  0x86   :  { %v51_v30 = vpop.permute.xlu1 %50  ;;  %v37_v31 = vpop.permute.xlu0 %36 }
  0x87   :  { %vm38_vm2 = vcmp.eq.s32.totalorder %v37_v31, %v28_v26  ;;  %vm39_vm3 = vcmp.eq.s32.totalorder %v37_v31, %v29_v29  ;;  %vm52_vm10 = vcmp.eq.s32.totalorder %v51_v30, %v28_v26  ;;  %vm53_vm12 = vcmp.eq.s32.totalorder %v51_v30, %v29_v29 }
  0x88   :  { %vm40_vm4 = vmor %vm33_vm0, %vm38_vm2 }
  0x89   :  { %vm41_vm5 = vmor %vm34_vm1, %vm39_vm3 }
  0x8a   :  { %vm47_vm8 = vmor %vm40_vm4, %vm45_vm6 }
  0x8b   :  { %v58_v32 = vpop.permute.xlu1 %57  ;;  %vm48_vm9 = vmor %vm41_vm5, %vm46_vm7  ;;  %v65_v33 = vpop.permute.xlu0 %64 }
  0x8c   :  { %vm59_vm11 = vcmp.eq.s32.totalorder %v58_v32, %v28_v26  ;;  %vm60_vm13 = vcmp.eq.s32.totalorder %v58_v32, %v29_v29  ;;  %vm54_vm14 = vmor %vm47_vm8, %vm52_vm10  ;;  %vm66_vm2 = vcmp.eq.s32.totalorder %v65_v33, %v28_v26  ;;  %vm67_vm3 = vcmp.eq.s32.totalorder %v65_v33, %v29_v29 }
  0x8d   :  { %vm55_vm15 = vmor %vm48_vm9, %vm53_vm12 }
  0x8e   :  { %vm61_vm0 = vmor %vm54_vm14, %vm59_vm11 }
  0x8f   :  { %vm62_vm1 = vmor %vm55_vm15, %vm60_vm13  ;;  %vm264_vm13 = vcmask 523264  }
  0x90   :  { %v72_v34 = vpop.permute.xlu1 %71  ;;  %vm68_vm6 = vmor %vm61_vm0, %vm66_vm2 }
  0x91   :  { %vm73_vm4 = vcmp.eq.s32.totalorder %v72_v34, %v28_v26  ;;  %vm74_vm5 = vcmp.eq.s32.totalorder %v72_v34, %v29_v29  ;;  %vm69_vm7 = vmor %vm62_vm1, %vm67_vm3 }
  0x92   :  { %vm75_vm8 = vmor %vm68_vm6, %vm73_vm4 }
  0x93   :  { %vm76_vm12 = vmor %vm69_vm7, %vm74_vm5 }
  0x95   :  { %v79_v35 = vpop.permute.xlu1 %78 }
  0x96   :  { %vm80_vm10 = vcmp.eq.s32.totalorder %v79_v35, %v28_v26  ;;  %vm81_vm9 = vcmp.eq.s32.totalorder %v79_v35, %v29_v29 }
  0x97   :  { %vm82_vm11 = vmor %vm75_vm8, %vm80_vm10 }
  0x98   :  { %vm83_vm14 = vmor %vm76_vm12, %vm81_vm9  ;;  %v84_v37 = vsel %vm82_vm11, 1.0, %v516_v36 }
  0x99   :  { %v85_v38 = vsel %vm83_vm14, 1.0, %v516_v36  ;;  %v86_v39 = vpack.c.bf16 %v84_v37, %v84_v37 }
  0x9a   :  { %v87_v40 = vpack.c.bf16 %v85_v38, %v85_v38 }
  0x9c   :  { %255 = vmatprep.mubr.bf16.mxu0 %v87_v40 }
  0x9d   :  { %256 = vmatmul.mubr.bf16.vlgmr.msra.gmra.mrb[0].mxu0 %v86_v39 }
 0x170   :  { %v431_v49 = vpop.f32.mrb[0].mxu0 }
 0x171   :  { %v432_v51 = vpop.f32.mrb[1].mxu0 }
 0x172   :  { %v433_v52 = vadd.f32 %v432_v51, %v431_v49  ;;  %v434_v53 = vpop.f32.mrb[2].mxu0 }
 0x173   :  { %v435_v54 = vpop.f32.mrb[3].mxu0 }
 0x174   :  { %v258_v55 = vadd.f32 %v433_v52, %v389_v50 }
 0x176   :  { %v263_v56 = vmax.f32 %v258_v55, 0.0 }
 0x178   :  { %265 = vst.msk [vmem:[#allocation2] sm:$0xff] %vm264_vm13, %v263_v56 }
 0x17f   :  { %v266_v57 = vld [vmem:[#allocation2] sm:$0xff] }
 0x180   :  { %v267_v58 = vpack.c.bf16 %v266_v57, %v266_v57 }
 0x182   :  { %414 = vmatmul.mubr.msk.bf16.vlgmr.msra.gmra.mrb[0].mxu1 %vm264_vm13, %v267_v58 }
 0x255   :  { %v366_v1 = vpop.f32.mrb[0].mxu1 }
 0x256   :  { %v367_v2 = vadd.f32 %v366_v1, %v281_v63  ;;  %v368_v3 = vpop.f32.mrb[1].mxu1 }
 0x257   :  { %v369_v4 = vadd.f32 %v368_v3, %v285_v0  ;;  %v370_v5 = vpop.f32.mrb[2].mxu1 }
 0x258   :  { %373 = vst [vmem:[#allocation3] sm:$0xff] %v367_v2  ;;  %v371_v6 = vpop.f32.mrb[3].mxu1 }
 0x259   :  { %374 = vst [vmem:[#allocation3 + $0x8] sm:$0xff] %v369_v4 }
 0x25a   :  { %495 = shalt.err (!%p492_p4)
}
 0x25b   :  { %s496_s21 = scalar_lea.hbm %s648_s5, 256 }
 0x25c   :  { %p497_p5 = scmp.ne.s32.totalorder %s648_s5, %s496_s21  ;;  %p500_p6 = scmp.lt.u32.totalorder %s496_s21, %s648_s5 }
 0x25e   :  { %p502_p7 = pnand %p500_p6, %p497_p5 }
 0x260   :  { %505 = shalt.err (!%p502_p7)
}
 0x261   :  { %384 = dma.vmem_to_hbm [thread:$0]  %s382_s18, 256, %s648_s5, [#allocation4]  }
 0x262   :  { %506 = dma.done.wait [#allocation4], 256  }
 0x263   :  { %507 = vsyncadd [#allocation4], 4294967040 }
 0x264   :  { %388 = vsyncpa [#allocation4], 1 }

</bundles_post_ra>
